<compile_context>
chip_gen: v5e
topology: v5e:2x2
jax: 0.10.0
libtpu: 0.0.40
codegen_flags: <defaults>
</compile_context>

<pallas_src>
import functools
import math

import jax
import jax.numpy as jnp
from jax.experimental import pallas as pl
from jax.experimental.pallas import tpu as pltpu


def _round_up(x, m):
    return -(-x // m) * m


def _vmem_limit_bytes():
    """Per-generation VMEM request: ~82% of physical (v7x ~52 MiB, v5e/v6e ~105 MiB)."""
    phys = 64 * 2 ** 20
    try:
        info = pltpu.get_tpu_info()
        phys = int(getattr(info, "vmem_capacity_bytes", phys) or phys)
    except Exception:
        pass
    return max(int(phys * 0.82), 16 * 2 ** 20)


def _choose_tiles(batch, seq_len, hidden, vocab, budget):
    """Pick (TB sequences per row tile, TV vocab columns per V block) under `budget`."""
    tb_unit = 8 // math.gcd(seq_len, 8)          # smallest TB with TN = TB*T % 8 == 0
    v128 = _round_up(max(vocab, 1), 128)
    h_lane = _round_up(max(hidden, 1), 128)      # lane padding of the x block
    h_sub = _round_up(max(hidden, 1), 16)        # sublane padding of the bf16 weight

    def est(tn, tv):
        return (2 * tn * h_lane * 2              # x  (bf16, double-buffered)
                + 2 * tn * 128 * 4               # gold (i32, lane-padded, double-buffered)
                + 2 * h_sub * tv * 2             # w_out block (bf16, double-buffered)
                + 5 * tn * tv * 4                # live f32/i32 [TN, TV] temporaries
                + 4 * tn * 128 * 4               # online accumulators (lane-padded)
                + 4 * tn * 128 * 4               # finalize [TN, 128] temporaries
                + 2 * 8 * 128 * 4)               # packed stats block

    tb_cap = min(128, _round_up(batch, tb_unit))     # lane limit for per-seq stats
    tb = tb_cap
    tv = 128
    while True:
        tn = tb * seq_len
        tv = min(v128, 4096)                     # lane-dense, capped V block
        while tv > 128 and est(tn, tv) > budget:
            tv -= 128
        if est(tn, tv) <= budget or tb <= tb_unit:
            break
        tb = max(tb_unit, ((tb // 2) // tb_unit) * tb_unit)   # shrink rows last

    # Prefer TN a multiple of 256 (v6e/v7x MXU M granularity) when large enough.
    unit256 = 256 // math.gcd(seq_len, 256)
    align = tb_unit * unit256 // math.gcd(tb_unit, unit256)
    if tb >= align:
        tb = (tb // align) * align

    # Guarantee >= 2 row tiles so the "parallel" axis can use both v7x TensorCores.
    while -(-batch // tb) < 2 and tb > tb_unit:
        tb = max(tb_unit, ((tb // 2) // tb_unit) * tb_unit)

    return tb, tv


def _decoder_kernel(gold_ref, x_ref, w_ref, stats_ref,
                    m_ref, s_ref, g_ref, idx_ref,
                    *, seq_len, v_total, v_pad):
    """One (row-tile i, vocab-block j) step of the fused decode hot path.

    gold_ref : [TN, 1]   int32 gold ids (0 = pad/ignore_index, -1 = alignment pad)
    x_ref    : [TN, H]   bf16  teacher-forced inputs (fetched once per row tile)
    w_ref    : [H, TV]   bf16  output-projection V block (streamed over j)
    stats_ref: [1, 8, 128] f32 packed per-row-tile reductions (written on last j):
        [0,0,0]=sum masked CE loss  [0,0,1]=sum(pred==gold) (unmasked, as in torch)
        [0,0,2]=sum(gold!=0)        [0,1,s]=wrong-token count for sequence slot s
    scratch  : running max / sum-exp / gold-logit (f32 [TN,1]) and argmax (i32 [TN,1]).
    """
    j = pl.program_id(1)

    @pl.when(j == 0)
    def _():
        m_ref[...] = jnp.full_like(m_ref, -jnp.inf)
        s_ref[...] = jnp.zeros_like(s_ref)
        g_ref[...] = jnp.zeros_like(g_ref)
        idx_ref[...] = jnp.full(idx_ref.shape, v_pad, dtype=jnp.int32)

    gold = gold_ref[...]                                            # [TN, 1] i32

    # MXU: bf16 feed, f32 accumulation, one lane-dense V block.
    logits = jnp.dot(x_ref[...], w_ref[...],
                     preferred_element_type=jnp.float32)            # [TN, TV] f32
    tn, tv = logits.shape

    # Global vocab index per lane (rematerialized per V block -- no [TN,V] live range).
    lane = jax.lax.broadcasted_iota(jnp.int32, (tn, tv), 1) + j * tv
    if v_pad != v_total:
        # Mask alignment-padded vocab columns (weight padded with zeros).
        logits = jnp.where(lane < v_total, logits, -jnp.inf)

    # Gold logit: only the block containing the gold id contributes.
    g_ref[...] += jnp.sum(jnp.where(lane == gold, logits, 0.0),
                          axis=-1, keepdims=True)

    # Online softmax statistics (f32 everywhere -- safe on v5e's f32-only EUP).
    bm = jnp.max(logits, axis=-1, keepdims=True)                    # [TN, 1]
    m_old = m_ref[...]
    m_new = jnp.maximum(m_old, bm)
    s_ref[...] = (s_ref[...] * jnp.exp(m_old - m_new)
                  + jnp.sum(jnp.exp(logits - m_new), axis=-1, keepdims=True))

    # Online first-index argmax: earlier blocks win ties -> torch-style first index.
    bidx = jnp.min(jnp.where(logits >= bm, lane, v_pad),
                   axis=-1, keepdims=True)                          # [TN, 1] i32
    idx_ref[...] = jnp.where(bm > m_old, bidx, idx_ref[...])
    m_ref[...] = m_new

    @pl.when(j == pl.num_programs(1) - 1)
    def _():
        # CE loss (ignore_index=0) in log-sum-exp form: lse - logit[gold].
        lse = m_ref[...] + jnp.log(s_ref[...])                      # [TN, 1]
        mask = gold > 0                                             # real non-pad tokens
        loss = jnp.where(mask, lse - g_ref[...], 0.0)
        pred = idx_ref[...]
        acc = (pred == gold).astype(jnp.float32)                    # unmasked (as torch)
        maskf = mask.astype(jnp.float32)
        wrong = jnp.where(mask & (pred != gold), 1.0, 0.0)          # [TN, 1]

        # Narrow sublane reductions first, then one tiny lane placement.
        loss_s = jnp.sum(loss, axis=0, keepdims=True)               # [1, 1]
        acc_s = jnp.sum(acc, axis=0, keepdims=True)
        mask_s = jnp.sum(maskf, axis=0, keepdims=True)
        col1 = jax.lax.broadcasted_iota(jnp.int32, (1, 128), 1)
        sums_row = jnp.where(col1 == 0, loss_s,
                   jnp.where(col1 == 1, acc_s,
                   jnp.where(col1 == 2, mask_s, 0.0)))              # [1, 128]

        # Per-sequence wrong counts: slot s covers rows [s*T, (s+1)*T).
        # Range compare instead of a vector integer divide (no VPU int-div).
        row_i = jax.lax.broadcasted_iota(jnp.int32, (tn, 128), 0)
        col_i = jax.lax.broadcasted_iota(jnp.int32, (tn, 128), 1)
        lo = col_i * seq_len
        in_seq = (row_i >= lo) & (row_i < lo + seq_len)
        wrong_row = jnp.sum(jnp.where(in_seq, wrong, 0.0),
                            axis=0, keepdims=True)                  # [1, 128]

        sub8 = jax.lax.broadcasted_iota(jnp.int32, (8, 128), 0)
        packed = jnp.where(sub8 == 0, sums_row,
                 jnp.where(sub8 == 1, wrong_row, 0.0))              # [8, 128]
        stats_ref[...] = packed[None]                               # [1, 8, 128]


def _run_decoder_kernel(gold_flat, x_flat, w_pad, *, seq_len, seqs_per_tile,
                        v_total, tv, vmem_limit):
    n, h = x_flat.shape
    v_pad = w_pad.shape[1]
    tn = seqs_per_tile * seq_len
    num_tiles = n // tn
    num_v = v_pad // tv

    kernel = functools.partial(_decoder_kernel, seq_len=seq_len,
                               v_total=v_total, v_pad=v_pad)
    return pl.pallas_call(
        kernel,
        out_shape=jax.ShapeDtypeStruct((num_tiles, 8, 128), jnp.float32),
        grid=(num_tiles, num_v),
        in_specs=[
            pl.BlockSpec((tn, 1), lambda i, j: (i, 0)),    # gold: once per row tile
            pl.BlockSpec((tn, h), lambda i, j: (i, 0)),    # x:    once per row tile
            pl.BlockSpec((h, tv), lambda i, j: (0, j)),    # w_out: streamed over V
        ],
        out_specs=pl.BlockSpec((1, 8, 128), lambda i, j: (i, 0, 0)),
        scratch_shapes=[
            pltpu.VMEM((tn, 1), jnp.float32),   # running max
            pltpu.VMEM((tn, 1), jnp.float32),   # running sum-exp
            pltpu.VMEM((tn, 1), jnp.float32),   # running gold logit
            pltpu.VMEM((tn, 1), jnp.int32),     # running first-index argmax
        ],
        compiler_params=pltpu.CompilerParams(
            dimension_semantics=("parallel", "arbitrary"),
            vmem_limit_bytes=int(vmem_limit),
        ),
    )(gold_flat, x_flat, w_pad)


def prepare_decoder_params(params):
    """One-time bf16 cast of the parameters (avoids per-forward cast traffic)."""
    return {"emb": params["emb"].astype(jnp.bfloat16),
            "w_out": params["w_out"].astype(jnp.bfloat16)}


def tf_token_seq_decoder_forward(params, gold_tokens):
    """Replicates TFTokenSeqDecoder.forward aggregation semantics.

    gold_tokens: [B, T] int32, 0 = padding / ignore_index (teacher forcing).
    Returns dict with 'loss', 'any_acc', 'seq_acc'.
    """
    emb = params["emb"]
    w_out = params["w_out"]
    if emb.dtype != jnp.bfloat16:
        emb = emb.astype(jnp.bfloat16)
    if w_out.dtype != jnp.bfloat16:
        w_out = w_out.astype(jnp.bfloat16)

    B, T = gold_tokens.shape
    V, H = emb.shape
    assert w_out.shape == (H, V)

    vmem_limit = _vmem_limit_bytes()
    TB, TV = _choose_tiles(B, T, H, V, budget=int(vmem_limit * 0.9))

    # Teacher-forced inputs: embedding of the previous gold token (BOS id = 1).
    # TODO(synk): pull this gather in-kernel (scalar-prefetch / DMA row gather) to
    # drop the [N, H] HBM round trip.
    bos = jnp.full((B, 1), 1, dtype=jnp.int32)
    prev_tok = jnp.concatenate([bos, gold_tokens.astype(jnp.int32)[:, :-1]], axis=1)
    x = jnp.take(emb, prev_tok, axis=0)                              # [B, T, H] bf16

    B_pad = _round_up(B, TB)
    gold_p = jnp.pad(gold_tokens.astype(jnp.int32), ((0, B_pad - B), (0, 0)),
                     constant_values=-1)                 # -1 marks alignment padding
    x_p = jnp.pad(x, ((0, B_pad - B), (0, 0), (0, 0)))

    gold_flat = gold_p.reshape(B_pad * T, 1)
    x_flat = x_p.reshape(B_pad * T, H)

    V_pad = _round_up(V, TV)
    w_pad = jnp.pad(w_out, ((0, 0), (0, V_pad - V)))     # padded cols masked in-kernel

    stats = _run_decoder_kernel(gold_flat, x_flat, w_pad,
                                seq_len=T, seqs_per_tile=TB,
                                v_total=V, tv=TV, vmem_limit=vmem_limit)

    loss_sum = stats[:, 0, 0].sum()
    acc_sum = stats[:, 0, 1].sum()
    mask_sum = stats[:, 0, 2].sum()
    wrong_counts = stats[:, 1, :TB].reshape(-1)[:B]      # per real sequence

    # losses.sum(-1).mean() == total masked loss / B
    loss = loss_sum / B
    # elemacc = accs.sum() / mask.sum()   (accs unmasked, as in the PyTorch reference)
    any_acc = acc_sum / mask_sum
    # seqacc = (accs.bool() | ~mask.bool()).all(-1).float().mean()
    seq_acc = (wrong_counts == 0).astype(jnp.float32).mean()

    return {"loss": loss, "any_acc": any_acc, "seq_acc": seq_acc}


def _reference_forward(params, gold_tokens):
    """Pure-JAX f32 reference of the same aggregation (for a sanity tolerance check)."""
    emb = params["emb"].astype(jnp.float32)
    w = params["w_out"].astype(jnp.float32)
    B, T = gold_tokens.shape
    bos = jnp.full((B, 1), 1, jnp.int32)
    prev = jnp.concatenate([bos, gold_tokens.astype(jnp.int32)[:, :-1]], axis=1)
    x = emb[prev]                                                    # [B, T, H]
    logits = jnp.einsum("bth,hv->btv", x, w)
    logp = jax.nn.log_softmax(logits, axis=-1)
    gold = gold_tokens.astype(jnp.int32)
    gold_lp = jnp.take_along_axis(logp, gold[..., None], axis=-1)[..., 0]
    maskf = (gold != 0).astype(jnp.float32)
    loss = (-(gold_lp) * maskf).sum(-1).mean()
    acc = (jnp.argmax(logits, axis=-1) == gold).astype(jnp.float32)
    any_acc = acc.sum() / maskf.sum()
    seq_acc = jnp.all((acc > 0) | (maskf == 0), axis=-1).astype(jnp.float32).mean()
    return {"loss": loss, "any_acc": any_acc, "seq_acc": seq_acc}


if __name__ == "__main__":
    B, T, H, V = 2, 8, 32, 128

    key = jax.random.PRNGKey(0)
    k_emb, k_w, k_tok = jax.random.split(key, 3)
    params_f32 = {
        "emb": 0.1 * jax.random.normal(k_emb, (V, H), dtype=jnp.float32),
        "w_out": 0.1 * jax.random.normal(k_w, (H, V), dtype=jnp.float32),
    }
    params = prepare_decoder_params(params_f32)          # one-time bf16 cast

    # Deterministic gold token sequences (0 = padding). Lengths 7 and 5; the final
    # all-zero column corresponds to the terminal while-loop iteration.
    raw = jax.random.randint(k_tok, (B, T), minval=2, maxval=V, dtype=jnp.int32)
    lengths = jnp.array([7, 5], dtype=jnp.int32)
    pos = jnp.arange(T, dtype=jnp.int32)[None, :]
    gold_tokens = jnp.where(pos < lengths[:, None], raw, 0)

    out = tf_token_seq_decoder_forward(params, gold_tokens)
    out = jax.tree_util.tree_map(jax.block_until_ready, out)

    # Sanity: finite loss close to the f32 reference, accuracies in [0, 1].
    ref = _reference_forward(params, gold_tokens)
    assert bool(jnp.isfinite(out["loss"]))
    ref_loss = float(ref["loss"])
    assert abs(float(out["loss"]) - ref_loss) <= 1e-2 + 2e-2 * abs(ref_loss)
    assert 0.0 <= float(out["any_acc"]) <= 1.0
    assert 0.0 <= float(out["seq_acc"]) <= 1.0

    print("KERNEL_OK")
</pallas_src>

<mosaic_0001>
module attributes {stable_mosaic.version = 11 : i64} {
  func.func @_decoder_kernel(%arg0: i32, %arg1: i32, %arg2: memref<8x1xi32, #tpu.memory_space<vmem>>, %arg3: memref<8x32xbf16, #tpu.memory_space<vmem>>, %arg4: memref<32x128xbf16, #tpu.memory_space<vmem>>, %arg5: memref<1x8x128xf32, #tpu.memory_space<vmem>>, %arg6: memref<8x1xf32, #tpu.memory_space<vmem>>, %arg7: memref<8x1xf32, #tpu.memory_space<vmem>>, %arg8: memref<8x1xf32, #tpu.memory_space<vmem>>, %arg9: memref<8x1xi32, #tpu.memory_space<vmem>>) attributes {dimension_semantics = [#tpu.dimension_semantics<parallel>, #tpu.dimension_semantics<arbitrary>], iteration_bounds = array<i64: 2, 1>, scalar_prefetch = 0 : i64, scratch_operands = 4 : i64, tpu.core_type = #tpu.core_type<tc>, window_params = [{transform_indices = @transform_0, window_bounds = array<i64: 8, 1>}, {transform_indices = @transform_1, window_bounds = array<i64: 8, 32>}, {transform_indices = @transform_2, window_bounds = array<i64: 32, 128>}, {transform_indices = @transform_3, window_bounds = array<i64: 1, 8, 128>}]} {
    %c0_i32 = arith.constant 0 : i32
    %0 = arith.cmpi eq, %arg1, %c0_i32 : i32
    %1 = arith.extui %0 : i1 to i32
    %c0_i32_0 = arith.constant 0 : i32
    %2 = arith.cmpi ne, %1, %c0_i32_0 : i32
    scf.if %2 {
      %cst_30 = arith.constant 0xFF800000 : f32
      %49 = vector.broadcast %cst_30 : f32 to vector<8x1xf32>
      %c0_31 = arith.constant 0 : index
      %c0_32 = arith.constant 0 : index
      %50 = vector.load %arg6[%c0_31, %c0_32] : memref<8x1xf32, #tpu.memory_space<vmem>>, vector<8x1xf32>
      tpu.vector_store %arg6[%c0_31, %c0_32], %49 {strides = array<i32>} : memref<8x1xf32, #tpu.memory_space<vmem>>, vector<8x1xf32>,
      %cst_33 = arith.constant 0.000000e+00 : f32
      %51 = vector.broadcast %cst_33 : f32 to vector<8x1xf32>
      %c0_34 = arith.constant 0 : index
      %c0_35 = arith.constant 0 : index
      %52 = vector.load %arg7[%c0_34, %c0_35] : memref<8x1xf32, #tpu.memory_space<vmem>>, vector<8x1xf32>
      tpu.vector_store %arg7[%c0_34, %c0_35], %51 {strides = array<i32>} : memref<8x1xf32, #tpu.memory_space<vmem>>, vector<8x1xf32>,
      %cst_36 = arith.constant 0.000000e+00 : f32
      %53 = vector.broadcast %cst_36 : f32 to vector<8x1xf32>
      %c0_37 = arith.constant 0 : index
      %c0_38 = arith.constant 0 : index
      %54 = vector.load %arg8[%c0_37, %c0_38] : memref<8x1xf32, #tpu.memory_space<vmem>>, vector<8x1xf32>
      tpu.vector_store %arg8[%c0_37, %c0_38], %53 {strides = array<i32>} : memref<8x1xf32, #tpu.memory_space<vmem>>, vector<8x1xf32>,
      %c128_i32_39 = arith.constant 128 : i32
      %55 = vector.broadcast %c128_i32_39 : i32 to vector<8x1xi32>
      %c0_40 = arith.constant 0 : index
      %c0_41 = arith.constant 0 : index
      %56 = vector.load %arg9[%c0_40, %c0_41] : memref<8x1xi32, #tpu.memory_space<vmem>>, vector<8x1xi32>
      tpu.vector_store %arg9[%c0_40, %c0_41], %55 {strides = array<i32>} : memref<8x1xi32, #tpu.memory_space<vmem>>, vector<8x1xi32>,
    } else {
    }
    %c0 = arith.constant 0 : index
    %c0_1 = arith.constant 0 : index
    %3 = vector.load %arg2[%c0, %c0_1] : memref<8x1xi32, #tpu.memory_space<vmem>>, vector<8x1xi32>
    %c0_2 = arith.constant 0 : index
    %c0_3 = arith.constant 0 : index
    %4 = vector.load %arg3[%c0_2, %c0_3] : memref<8x32xbf16, #tpu.memory_space<vmem>>, vector<8x32xbf16>
    %c0_4 = arith.constant 0 : index
    %c0_5 = arith.constant 0 : index
    %5 = vector.load %arg4[%c0_4, %c0_5] : memref<32x128xbf16, #tpu.memory_space<vmem>>, vector<32x128xbf16>
    %cst = arith.constant dense<0.000000e+00> : vector<8x128xf32>
    %6 = tpu.matmul %4, %5, %cst {dimension_numbers = #tpu.dot_dimension_numbers<[1], [0], [0], [1], [0, 0, 1, 1], [], []>} : vector<8x32xbf16>, vector<32x128xbf16>, vector<8x128xf32> -> vector<8x128xf32>
    %7 = tpu.iota {dimensions = array<i32: 1>} : vector<8x128xi32>
    %c128_i32 = arith.constant 128 : i32
    %8 = arith.muli %arg1, %c128_i32 : i32
    %9 = vector.broadcast %8 : i32 to vector<8x128xi32>
    %10 = arith.addi %7, %9 : vector<8x128xi32>
    %c0_6 = arith.constant 0 : index
    %c0_7 = arith.constant 0 : index
    %11 = vector.load %arg8[%c0_6, %c0_7] : memref<8x1xf32, #tpu.memory_space<vmem>>, vector<8x1xf32>
    %12 = vector.broadcast %3 : vector<8x1xi32> to vector<8x128xi32>
    %13 = arith.cmpi eq, %10, %12 : vector<8x128xi32>
    %cst_8 = arith.constant 0.000000e+00 : f32
    %14 = vector.broadcast %cst_8 : f32 to vector<8x128xf32>
    %15 = arith.select %13, %6, %14 : vector<8x128xi1>, vector<8x128xf32>
    %cst_9 = arith.constant dense<0.000000e+00> : vector<8xf32>
    %16 = vector.multi_reduction <add>, %15, %cst_9 [1] : vector<8x128xf32> to vector<8xf32>
    %17 = vector.shape_cast %16 : vector<8xf32> to vector<8x1xf32>
    %18 = arith.addf %11, %17 : vector<8x1xf32>
    %c0_10 = arith.constant 0 : index
    %c0_11 = arith.constant 0 : index
    %19 = vector.load %arg8[%c0_10, %c0_11] : memref<8x1xf32, #tpu.memory_space<vmem>>, vector<8x1xf32>
    tpu.vector_store %arg8[%c0_10, %c0_11], %18 {strides = array<i32>} : memref<8x1xf32, #tpu.memory_space<vmem>>, vector<8x1xf32>,
    %cst_12 = arith.constant dense<0xFF800000> : vector<8xf32>
    %20 = vector.multi_reduction <maximumf>, %6, %cst_12 [1] : vector<8x128xf32> to vector<8xf32>
    %21 = vector.shape_cast %20 : vector<8xf32> to vector<8x1xf32>
    %c0_13 = arith.constant 0 : index
    %c0_14 = arith.constant 0 : index
    %22 = vector.load %arg6[%c0_13, %c0_14] : memref<8x1xf32, #tpu.memory_space<vmem>>, vector<8x1xf32>
    %23 = arith.maximumf %22, %21 : vector<8x1xf32>
    %c0_15 = arith.constant 0 : index
    %c0_16 = arith.constant 0 : index
    %24 = vector.load %arg7[%c0_15, %c0_16] : memref<8x1xf32, #tpu.memory_space<vmem>>, vector<8x1xf32>
    %25 = arith.subf %22, %23 : vector<8x1xf32>
    %26 = math.exp %25 : vector<8x1xf32>
    %27 = arith.mulf %24, %26 : vector<8x1xf32>
    %28 = vector.broadcast %23 : vector<8x1xf32> to vector<8x128xf32>
    %29 = arith.subf %6, %28 : vector<8x128xf32>
    %30 = math.exp %29 : vector<8x128xf32>
    %cst_17 = arith.constant dense<0.000000e+00> : vector<8xf32>
    %31 = vector.multi_reduction <add>, %30, %cst_17 [1] : vector<8x128xf32> to vector<8xf32>
    %32 = vector.shape_cast %31 : vector<8xf32> to vector<8x1xf32>
    %33 = arith.addf %27, %32 : vector<8x1xf32>
    %c0_18 = arith.constant 0 : index
    %c0_19 = arith.constant 0 : index
    %34 = vector.load %arg7[%c0_18, %c0_19] : memref<8x1xf32, #tpu.memory_space<vmem>>, vector<8x1xf32>
    tpu.vector_store %arg7[%c0_18, %c0_19], %33 {strides = array<i32>} : memref<8x1xf32, #tpu.memory_space<vmem>>, vector<8x1xf32>,
    %35 = vector.broadcast %21 : vector<8x1xf32> to vector<8x128xf32>
    %36 = arith.cmpf oge, %6, %35 : vector<8x128xf32>
    %c128_i32_20 = arith.constant 128 : i32
    %37 = vector.broadcast %c128_i32_20 : i32 to vector<8x128xi32>
    %38 = arith.select %36, %10, %37 : vector<8x128xi1>, vector<8x128xi32>
    %cst_21 = arith.constant dense<2147483647> : vector<8xi32>
    %39 = vector.multi_reduction <minsi>, %38, %cst_21 [1] : vector<8x128xi32> to vector<8xi32>
    %40 = vector.shape_cast %39 : vector<8xi32> to vector<8x1xi32>
    %41 = arith.cmpf ogt, %21, %22 : vector<8x1xf32>
    %c0_22 = arith.constant 0 : index
    %c0_23 = arith.constant 0 : index
    %42 = vector.load %arg9[%c0_22, %c0_23] : memref<8x1xi32, #tpu.memory_space<vmem>>, vector<8x1xi32>
    %43 = arith.select %41, %40, %42 : vector<8x1xi1>, vector<8x1xi32>
    %c0_24 = arith.constant 0 : index
    %c0_25 = arith.constant 0 : index
    %44 = vector.load %arg9[%c0_24, %c0_25] : memref<8x1xi32, #tpu.memory_space<vmem>>, vector<8x1xi32>
    tpu.vector_store %arg9[%c0_24, %c0_25], %43 {strides = array<i32>} : memref<8x1xi32, #tpu.memory_space<vmem>>, vector<8x1xi32>,
    %c0_26 = arith.constant 0 : index
    %c0_27 = arith.constant 0 : index
    %45 = vector.load %arg6[%c0_26, %c0_27] : memref<8x1xf32, #tpu.memory_space<vmem>>, vector<8x1xf32>
    tpu.vector_store %arg6[%c0_26, %c0_27], %23 {strides = array<i32>} : memref<8x1xf32, #tpu.memory_space<vmem>>, vector<8x1xf32>,
    %c0_i32_28 = arith.constant 0 : i32
    %46 = arith.cmpi eq, %arg1, %c0_i32_28 : i32
    %47 = arith.extui %46 : i1 to i32
    %c0_i32_29 = arith.constant 0 : i32
    %48 = arith.cmpi ne, %47, %c0_i32_29 : i32
    scf.if %48 {
      %c0_30 = arith.constant 0 : index
      %c0_31 = arith.constant 0 : index
      %49 = vector.load %arg6[%c0_30, %c0_31] : memref<8x1xf32, #tpu.memory_space<vmem>>, vector<8x1xf32>
      %c0_32 = arith.constant 0 : index
      %c0_33 = arith.constant 0 : index
      %50 = vector.load %arg7[%c0_32, %c0_33] : memref<8x1xf32, #tpu.memory_space<vmem>>, vector<8x1xf32>
      %51 = math.log %50 : vector<8x1xf32>
      %52 = arith.addf %49, %51 : vector<8x1xf32>
      %c0_i32_34 = arith.constant 0 : i32
      %53 = vector.broadcast %c0_i32_34 : i32 to vector<8x1xi32>
      %54 = arith.cmpi sgt, %3, %53 : vector<8x1xi32>
      %c0_35 = arith.constant 0 : index
      %c0_36 = arith.constant 0 : index
      %55 = vector.load %arg8[%c0_35, %c0_36] : memref<8x1xf32, #tpu.memory_space<vmem>>, vector<8x1xf32>
      %56 = arith.subf %52, %55 : vector<8x1xf32>
      %cst_37 = arith.constant 0.000000e+00 : f32
      %57 = vector.broadcast %cst_37 : f32 to vector<8x1xf32>
      %58 = arith.select %54, %56, %57 : vector<8x1xi1>, vector<8x1xf32>
      %c0_38 = arith.constant 0 : index
      %c0_39 = arith.constant 0 : index
      %59 = vector.load %arg9[%c0_38, %c0_39] : memref<8x1xi32, #tpu.memory_space<vmem>>, vector<8x1xi32>
      %60 = arith.cmpi eq, %59, %3 : vector<8x1xi32>
      %61 = arith.extui %60 : vector<8x1xi1> to vector<8x1xi32>
      %62 = arith.sitofp %61 : vector<8x1xi32> to vector<8x1xf32>
      %63 = arith.extui %54 : vector<8x1xi1> to vector<8x1xi32>
      %64 = arith.sitofp %63 : vector<8x1xi32> to vector<8x1xf32>
      %65 = arith.cmpi ne, %59, %3 : vector<8x1xi32>
      %66 = arith.andi %54, %65 : vector<8x1xi1>
      %cst_40 = arith.constant 1.000000e+00 : f32
      %cst_41 = arith.constant 0.000000e+00 : f32
      %67 = vector.broadcast %cst_40 : f32 to vector<8x1xf32>
      %68 = vector.broadcast %cst_41 : f32 to vector<8x1xf32>
      %69 = arith.select %66, %67, %68 : vector<8x1xi1>, vector<8x1xf32>
      %cst_42 = arith.constant dense<0.000000e+00> : vector<1xf32>
      %70 = vector.multi_reduction <add>, %58, %cst_42 [0] : vector<8x1xf32> to vector<1xf32>
      %71 = vector.shape_cast %70 : vector<1xf32> to vector<1x1xf32>
      %cst_43 = arith.constant dense<0.000000e+00> : vector<1xf32>
      %72 = vector.multi_reduction <add>, %62, %cst_43 [0] : vector<8x1xf32> to vector<1xf32>
      %73 = vector.shape_cast %72 : vector<1xf32> to vector<1x1xf32>
      %cst_44 = arith.constant dense<0.000000e+00> : vector<1xf32>
      %74 = vector.multi_reduction <add>, %64, %cst_44 [0] : vector<8x1xf32> to vector<1xf32>
      %75 = vector.shape_cast %74 : vector<1xf32> to vector<1x1xf32>
      %76 = tpu.iota {dimensions = array<i32: 1>} : vector<1x128xi32>
      %c0_i32_45 = arith.constant 0 : i32
      %77 = vector.broadcast %c0_i32_45 : i32 to vector<1x128xi32>
      %78 = arith.cmpi eq, %76, %77 : vector<1x128xi32>
      %c1_i32 = arith.constant 1 : i32
      %79 = vector.broadcast %c1_i32 : i32 to vector<1x128xi32>
      %80 = arith.cmpi eq, %76, %79 : vector<1x128xi32>
      %c2_i32 = arith.constant 2 : i32
      %81 = vector.broadcast %c2_i32 : i32 to vector<1x128xi32>
      %82 = arith.cmpi eq, %76, %81 : vector<1x128xi32>
      %cst_46 = arith.constant 0.000000e+00 : f32
      %83 = vector.shape_cast %75 : vector<1x1xf32> to vector<1x1xf32>
      %84 = vector.broadcast %83 : vector<1x1xf32> to vector<1x128xf32>
      %85 = vector.broadcast %cst_46 : f32 to vector<1x128xf32>
      %86 = arith.select %82, %84, %85 : vector<1x128xi1>, vector<1x128xf32>
      %87 = vector.shape_cast %73 : vector<1x1xf32> to vector<1x1xf32>
      %88 = vector.broadcast %87 : vector<1x1xf32> to vector<1x128xf32>
      %89 = arith.select %80, %88, %86 : vector<1x128xi1>, vector<1x128xf32>
      %90 = vector.shape_cast %71 : vector<1x1xf32> to vector<1x1xf32>
      %91 = vector.broadcast %90 : vector<1x1xf32> to vector<1x128xf32>
      %92 = arith.select %78, %91, %89 : vector<1x128xi1>, vector<1x128xf32>
      %93 = tpu.iota {dimensions = array<i32: 0>} : vector<8x128xi32>
      %94 = tpu.iota {dimensions = array<i32: 1>} : vector<8x128xi32>
      %c8_i32 = arith.constant 8 : i32
      %95 = vector.broadcast %c8_i32 : i32 to vector<8x128xi32>
      %96 = arith.muli %94, %95 : vector<8x128xi32>
      %97 = arith.cmpi sge, %93, %96 : vector<8x128xi32>
      %c8_i32_47 = arith.constant 8 : i32
      %98 = vector.broadcast %c8_i32_47 : i32 to vector<8x128xi32>
      %99 = arith.addi %96, %98 : vector<8x128xi32>
      %100 = arith.cmpi slt, %93, %99 : vector<8x128xi32>
      %101 = arith.andi %97, %100 : vector<8x128xi1>
      %cst_48 = arith.constant 0.000000e+00 : f32
      %102 = vector.shape_cast %69 : vector<8x1xf32> to vector<8x1xf32>
      %103 = vector.broadcast %102 : vector<8x1xf32> to vector<8x128xf32>
      %104 = vector.broadcast %cst_48 : f32 to vector<8x128xf32>
      %105 = arith.select %101, %103, %104 : vector<8x128xi1>, vector<8x128xf32>
      %cst_49 = arith.constant dense<0.000000e+00> : vector<128xf32>
      %106 = vector.multi_reduction <add>, %105, %cst_49 [0] : vector<8x128xf32> to vector<128xf32>
      %107 = vector.shape_cast %106 : vector<128xf32> to vector<1x128xf32>
      %108 = tpu.iota {dimensions = array<i32: 0>} : vector<8x128xi32>
      %c0_i32_50 = arith.constant 0 : i32
      %109 = vector.broadcast %c0_i32_50 : i32 to vector<8x128xi32>
      %110 = arith.cmpi eq, %108, %109 : vector<8x128xi32>
      %c1_i32_51 = arith.constant 1 : i32
      %111 = vector.broadcast %c1_i32_51 : i32 to vector<8x128xi32>
      %112 = arith.cmpi eq, %108, %111 : vector<8x128xi32>
      %cst_52 = arith.constant 0.000000e+00 : f32
      %113 = vector.shape_cast %107 : vector<1x128xf32> to vector<1x128xf32>
      %114 = vector.broadcast %113 : vector<1x128xf32> to vector<8x128xf32>
      %115 = vector.broadcast %cst_52 : f32 to vector<8x128xf32>
      %116 = arith.select %112, %114, %115 : vector<8x128xi1>, vector<8x128xf32>
      %117 = vector.shape_cast %92 : vector<1x128xf32> to vector<1x128xf32>
      %118 = vector.broadcast %117 : vector<1x128xf32> to vector<8x128xf32>
      %119 = arith.select %110, %118, %116 : vector<8x128xi1>, vector<8x128xf32>
      %120 = vector.shape_cast %119 : vector<8x128xf32> to vector<1x8x128xf32>
      %c0_53 = arith.constant 0 : index
      %c0_54 = arith.constant 0 : index
      %c0_55 = arith.constant 0 : index
      %121 = vector.load %arg5[%c0_53, %c0_54, %c0_55] : memref<1x8x128xf32, #tpu.memory_space<vmem>>, vector<1x8x128xf32>
      tpu.vector_store %arg5[%c0_53, %c0_54, %c0_55], %120 {strides = array<i32>} : memref<1x8x128xf32, #tpu.memory_space<vmem>>, vector<1x8x128xf32>,
    } else {
    }
    return
  }
  func.func @transform_0(%arg0: i32, %arg1: i32) -> (i32, i32) {
    %c0_i32 = arith.constant 0 : i32
    %c0_i32_0 = arith.constant 0 : i32
    return %arg0, %c0_i32 : i32, i32
  }
  func.func @transform_1(%arg0: i32, %arg1: i32) -> (i32, i32) {
    %c0_i32 = arith.constant 0 : i32
    %c0_i32_0 = arith.constant 0 : i32
    return %arg0, %c0_i32 : i32, i32
  }
  func.func @transform_2(%arg0: i32, %arg1: i32) -> (i32, i32) {
    %c0_i32 = arith.constant 0 : i32
    %c0_i32_0 = arith.constant 0 : i32
    return %c0_i32, %arg1 : i32, i32
  }
  func.func @transform_3(%arg0: i32, %arg1: i32) -> (i32, i32, i32) {
    %c0_i32 = arith.constant 0 : i32
    %c0_i32_0 = arith.constant 0 : i32
    %c0_i32_1 = arith.constant 0 : i32
    return %arg0, %c0_i32, %c0_i32_0 : i32, i32, i32
  }
}

</mosaic_0001>

<bundles_post_ra>
// kernel: tpu_custom_call.1
= control target key start
LH: loop header
LB: loop body
LE: loop exit
PB: predicated region body
PF: predicated region fallthrough
CT: control target
= control target key end

     0   :  { %8 = vsyncpa [#allocation7], 0  ;;  %s956_s0 = inlined_call_operand.vmem [shape: s32[16,1], index: 0, kind: input, shape index: {}]   ;;  %s957_s1 = inlined_call_operand.hbm [shape: bf16[16,32], index: 1, kind: input, shape index: {}]   ;;  %s958_s2 = inlined_call_operand.vmem [shape: bf16[32,128], index: 2, kind: input, shape index: {}]   ;;  %s959_s3 = inlined_call_operand.hbm [shape: f32[2,8,128], index: 3, kind: output, shape index: {}]  }
   0x1   :  { %10 = vsyncpa [#allocation7 + $0x1], 0 }
   0x2   :  { %11 = vsyncpa [#allocation8], 0 }
   0x3   :  { %13 = vsyncpa [#allocation8 + $0x1], 0  ;;  %s786_s12 = smov 0   ;;  %s788_s13 = smov 0  }
   0x4   :  { %s790_s14 = smov 0   ;;  %s792_s15 = smov 0  }
   0x5   :  { %s794_s16 = smov 0   ;;  %s796_s17 = smov 0  }
   0x6 LB: > { %s545_s18 = sadd.s32 4294967295, %s760_s17   ;;  %s546_s19 = sadd.s32 4294967294, %s760_s17   ;;  %s760_s17 = sphi %s796_s17, %s19_s17   ;;  %s756_s16 = sphi %s794_s16, %s968_s16   ;;  %s752_s15 = sphi %s792_s15, %s967_s15   ;;  %s748_s14 = sphi %s790_s14, %s966_s14   ;;  %s744_s13 = sphi %s788_s13, %s965_s13   ;;  %s740_s12 = sphi %s786_s12, %s964_s12  }
   0x7   : > { %s31_s20 = sadd.s32 1, %s756_s16  ;;  %s64_s21 = sadd.s32 1, %s748_s14 }
   0x8   : > { %p33_p0 = scmp.ge.s32.totalorder %s31_s20, 2  ;;  %p71_p1 = scmp.ne.s32.totalorder %s748_s14, %s744_s13 }
   0x9   : > { %p72_p2 = scmp.eq.s32.totalorder %s760_s17, 0  ;;  %p77_p3 = scmp.ne.s32.totalorder %s744_s13, %s740_s12 }
   0xa   : > { %s970_s20 = smov (%p33_p0, %s31_s20), 0  ;;  %p78_p5 = scmp.eq.s32.totalorder %s545_s18, 0 }
   0xb   : > { %p827_p4 = por %p72_p2, %p71_p1  ;;  %s61_s23 = ssub.s32 %s756_s16, %s970_s20 }
   0xc   : > { %p127_p6 = scmp.eq.s32.totalorder %s545_s18, 1  ;;  %p62_p7 = scmp.eq.s32.totalorder %s61_s23, 0 }
   0xd   : > { %p833_p8 = por %p78_p5, %p77_p3  ;;  %p133_p10 = scmp.eq.s32.totalorder %s546_s19, 1 }
   0xe   : > { %p837_p9 = por %p127_p6, %p71_p1  ;;  %p549_p12 = scmp.ge.s32.totalorder %s760_s17, 2 }
   0xf   : > { %s842_s26 = scalar_select %p62_p7, %s748_s14, %s64_s21  }
  0x10   : > { %p844_p11 = por %p133_p10, %p77_p3  ;;  %p585_p13 = scmp.lt.s32.totalorder %s760_s17, 2 }
  0x11   : > { %s167_s28 = sand.u32 1, %s748_s14   ;;  %s551_s30 = sshll.u32 %s756_s16, 2 }
  0x12   : > { %s550_s29 = sshll.u32 %s167_s28, 2  ;;  %s175_s6 = scalar_lea.hbm %s957_s1, %s551_s30 }
  0x13   : > { %s171_s7 = scalar_lea.vmem [#allocation6], %s550_s29  ;;  %s177_s9 = sshll.u32 %s175_s6, 4  ;;  %s178_s9 = int_to_ptr.hbm [resolvable:$true] %s177_s9 }
  0x14   : > { %s179_s8 = sshll.u32 %s171_s7, 4  ;;  %p578_p0 = pnand %p585_p13, %p827_p4  ;;  %s180_s8 = int_to_ptr.vmem [resolvable:$true] %s179_s8 }
  0x15   : > { %p552_p1 = scmp.ge.s32.totalorder %s760_s17, 1  ;;  %p184_p2 = scmp.lt.s32.totalorder %s760_s17, 3 }
  0x16   : > { %s168_s10 = scalar_lea.sflag [#allocation7], %s167_s28 }
  0x17   : > { %580 = dma.hbm_to_vmem [thread:$0]  (!%p578_p0), %s178_s9, 64, %s180_s8, %s168_s10  }
  0x18   : > { %p185_p3 = pnand %p552_p1, %p184_p2 }
  0x19   : > { %s860_s11 = sand.u32 (!%p185_p3), 1, %s744_s13  }
  0x1a   : > { %188 = sbr.rel (%p185_p3) target bundleno = 692 (0x2b4), region = 32  ;;  %s553_s18 = sshll.u32 (!%p185_p3), %s860_s11, 2 }
  0x1b   : > { %s191_s19 = scalar_lea.sflag (!%p185_p3), [#allocation7], %s860_s11  ;;  %s194_s21 = scalar_lea.vmem (!%p185_p3), [#allocation6], %s553_s18 }
  0x1f   : > { %731 = dma.done.wait (%p833_p8), %s191_s19, 64  }
  0x20   : > { %733 = vsyncadd (%p833_p8), %s191_s19, 4294967232  ;;  %v572_v0 = vld [vmem:[%s958_s2 + $0x8] sm:$0xff]  ;;  %v571_v1 = vld [vmem:[%s958_s2] sm:$0xff]  ;;  %vm262_vm0 = vcmask 261120   ;;  %vm239_vm1 = vcmask 7168   ;;  %v762_v3 = vmov -inf   ;;  %v279_v8 = vlaneseq }
  0x21   : > { %272 = vmatpush.bf16.msra.mxu0 %v572_v0  ;;  %v245_v2 = vld [vmem:[%s194_s21] sm:$0xf]  ;;  %240 = vst.msk [vmem:[#allocation2] sm:$0xff] %vm239_vm1, %v762_v3  ;;  %v763_v6 = vmov 0   ;;  %v764_v7 = vmov 0.0   ;;  %p226_p4 = scmp.lt.s32.totalorder %s752_s15, 1 }
  0x22   : > { %639 = vset.pattern.permute.xlu0 %v763_v6  ;;  %640 = vset.pattern.permute.xlu1 %v763_v6  ;;  %241 = vst.msk [vmem:[#allocation3] sm:$0xff] %vm239_vm1, %v764_v7  ;;  %v882_v10 = vand.u32 127, %v279_v8  ;;  %v765_v36 = vmov 128   ;;  %s554_s7 = sshll.u32 %s860_s11, 3  ;;  %s568_s8 = sshll.u32 %s752_s15, 3 }
  0x23   : > { %641 = vset.pattern.permute.xlu2 %v763_v6  ;;  %242 = vst.msk [vmem:[#allocation4] sm:$0xff] %vm239_vm1, %v764_v7  ;;  %s227_s24 = scalar_select %p226_p4, %s752_s15, 1 }
  0x24   : > { %243 = vst.msk [vmem:[#allocation5] sm:$0xff] %vm239_vm1, %v765_v36  ;;  %s435_s18 = scalar_lea.hbm %s959_s3, %s568_s8  ;;  %vm381_vm13 = vcmp.eq.s32.totalorder %v882_v10, 2  ;;  %vm380_vm14 = vcmp.eq.s32.totalorder %v882_v10, 1  ;;  %vm379_vm15 = vcmp.eq.s32.totalorder %v882_v10, 0  ;;  %s225_s19 = scalar_lea.vmem [#allocation9], %s554_s7 }
  0x25   : > { %273 = vmatpush.bf16.msra.mxu0 %v571_v1  ;;  %s555_s30 = sshll.u32 %s227_s24, 3  ;;  %s437_s21 = sshll.u32 %s225_s19, 4  ;;  %s438_s21 = int_to_ptr.vmem [resolvable:$true] %s437_s21 }
  0x26   : > { %s229_s6 = scalar_lea.vmem %s956_s0, %s555_s30  ;;  %s439_s22 = sshll.u32 %s435_s18, 4  ;;  %s440_s22 = int_to_ptr.hbm [resolvable:$true] %s439_s22 }
  0x27   : > { %v889_v16 = vld [vmem:[%s229_s6] sm:$0xff]  ;;  %s425_s15 = scalar_lea.sflag [#allocation8], %s860_s11  ;;  %s692_s23 = sshra.s32 %s440_s22, 4  ;;  %s693_s23 = int_to_ptr.hbm [resolvable:$true] %s692_s23 }
  0x28   : > { %564 = vmatmul.msk.bf16.vlgmr.msra.gmra.mxu0 %vm262_vm0, %v245_v2  ;;  %v297_v9 = vld [vmem:[#allocation2] sm:$0xff]  ;;  %vm345_vm3 = vcmp.gt.s32.totalorder %v889_v16, 0  ;;  %s694_s28 = scalar_lea.hbm %s693_s23, 8  ;;  %s698_s30 = scalar_lea.hbm %s959_s3, 16 }
  0x29   : > { %v566_v18 = vsel %vm345_vm3, 1.0, %v764_v7  ;;  %v299_v39 = vld [vmem:[#allocation3] sm:$0xff]  ;;  %p695_p5 = scmp.ne.s32.totalorder %s693_s23, %s694_s28  ;;  %p699_p8 = scmp.lt.s32.totalorder %s693_s23, %s959_s3 }
  0x2a   : > { %v372_v19 = vsel %vm239_vm1, %v566_v18, 0.0  ;;  %v284_v51 = vld [vmem:[#allocation4] sm:$0xff]  ;;  %v401_v18 = vshrl.u32 %v279_v8, 7  ;;  %p700_p10 = scmp.lt.s32.totalorder %s698_s30, %s694_s28 }
  0x2b   : > { %v373_v20 = vrot.slane %v372_v19, 4  ;;  %v333_v47 = vld [vmem:[#allocation5] sm:$0xff]  ;;  %p696_p6 = pnand %p695_p5, %p837_p9 }
  0x2c   : > { %vm420_vm0 = vcmp.eq.s32.totalorder %v401_v18, 1  ;;  %p701_p13 = por %p700_p10, %p699_p8 }
  0x2d   : > { %v374_v21 = vadd.f32 %v373_v20, %v372_v19  ;;  %p697_p7 = pneg %p696_p6 }
  0x2f   : > { %v375_v22 = vrot.slane %v374_v21, 2  ;;  %p702_p0 = pnand %p701_p13, %p697_p7 }
  0x31   : > { %v376_v23 = vadd.f32 %v375_v22, %v374_v21 }
  0x33   : > { %v377_v24 = vrot.slane %v376_v23, 1 }
  0x35   : > { %v378_v25 = vadd.f32 %v377_v24, %v376_v23 }
  0xa5   : > { %v275_v4 = vpop.f32.mrf.mxu0 }
  0xa6   : > { %295 = vmax.xlane.f32.xlu0 %v275_v4 }
  0xad   : > { %v277_v5 = vpop.f32.mrf.mxu0 }
 0x119   : > { %v296_v11 = vpop.xlane.xlu0 %295 }
 0x11a   : > { %v298_v12 = vmax.f32 %v297_v9, %v296_v11  ;;  %vm316_vm2 = vcmp.ge.f32.partialorder %v275_v4, %v296_v11  ;;  %vm332_vm6 = vcmp.gt.f32.partialorder %v296_v11, %v297_v9 }
 0x11b   : > { %v317_v13 = vsel %vm316_vm2, %v882_v10, 128 }
 0x11c   : > { %v300_v14 = vsub.f32 %v297_v9, %v298_v12  ;;  %336 = vst.msk [vmem:[#allocation2] sm:$0xff] %vm239_vm1, %v298_v12  ;;  %306 = vperm.xlu0 %639, %v298_v12   ;;  %v319_v15 = vshra.s32 %v317_v13, 16  ;;  %v318_v31 = vand.u32 65535, %v317_v13 }
 0x11e   : > { %v321_v17 = vcvt.s32.f32 %v319_v15  ;;  %v320_v32 = vcvt.s32.f32 %v318_v31  ;;  %v301_v37 = vmul.f32 1.442695, %v300_v14 }
 0x120   : > { %322 = vmin.xlane.f32.xlu1 %v321_v17 }
 0x123   : > { %v340_v62 = vld [vmem:[#allocation2] sm:$0xff] }
 0x139   : > { %286 = vperm.xlu1 %640, %v889_v16  }
 0x141   : > { %384 = vperm.xlu1 %640, %v378_v25  }
 0x18e   : > { %v307_v26 = vpop.permute.xlu0 %306 }
 0x18f   : > { %v309_v27 = vsub.f32 %v275_v4, %v307_v26 }
 0x191   : > { %v310_v28 = vmul.f32 1.442695, %v309_v27 }
 0x193   : > { %642 = vpow2.f32 %v310_v28  ;;  %v323_v30 = vpop.xlane.xlu1 %322 }
 0x194   : > { %vm324_vm4 = vcmp.eq.f32.partialorder %v321_v17, %v323_v30  ;;  %644 = vpow2.f32 %v301_v37  ;;  %v329_v43 = vcvt.f32.s32 %v323_v30  ;;  %v402_v17 = vmul.u32 8, %v882_v10 }
 0x195   : > { %v325_v33 = vsel %vm324_vm4, %v320_v32, inf }
 0x196   : > { %v330_v45 = vshll.u32 %v329_v43, 16  ;;  %v404_v19 = vadd.s32 8, %v402_v17  ;;  %vm403_vm10 = vcmp.ge.s32.totalorder %v401_v18, %v402_v17 }
 0x198   : > { %vm405_vm11 = vcmp.lt.s32.totalorder %v401_v18, %v404_v19 }
 0x199   : > { %v643_v29 = vpop.eup %642  ;;  %vm406_vm12 = vmand %vm403_vm10, %vm405_vm11 }
 0x19a   : > { %312 = vadd.xlane.f32.xlu2 %v643_v29  ;;  %v645_v38 = vpop.eup %644 }
 0x19b   : > { %v303_v40 = vmul.f32 %v645_v38, %v299_v39 }
 0x1a2   : > { %326 = vmin.xlane.f32.xlu2 %v325_v33 }
 0x1ab   : > { %v287_v34 = vpop.permute.xlu1 %286 }
 0x1ac   : > { %vm288_vm5 = vcmp.eq.s32.totalorder %v882_v10, %v287_v34 }
 0x1ad   : > { %v289_v35 = vsel %vm288_vm5, %v275_v4, 0.0 }
 0x1ae   : > { %290 = vadd.xlane.f32.xlu2 %v289_v35 }
 0x1b3   : > { %v385_v24 = vpop.permute.xlu1 %384 }
 0x1b4   : > { %v387_v28 = vsel %vm381_vm13, %v385_v24, 0.0 }
 0x20d   : > { %v313_v41 = vpop.xlane.xlu2 %312 }
 0x20e   : > { %v314_v42 = vadd.f32 %v313_v41, %v303_v40 }
 0x210   : > { %315 = vst.msk [vmem:[#allocation3] sm:$0xff] %vm239_vm1, %v314_v42 }
 0x215   : > { %v327_v44 = vpop.xlane.xlu2 %326 }
 0x216   : > { %v328_v46 = vcvt.f32.s32 %v327_v44 }
 0x217   : > { %v341_v50 = vld [vmem:[#allocation3] sm:$0xff] }
 0x218   : > { %v331_v48 = vadd.s32 %v330_v45, %v328_v46  ;;  %646 = vlog2.f32 %v341_v50 }
 0x21a   : > { %v334_v49 = vsel %vm332_vm6, %v331_v48, %v333_v47 }
 0x21b   : > { %335 = vst.msk [vmem:[#allocation5] sm:$0xff] %vm239_vm1, %v334_v49 }
 0x21e   : > { %v647_v55 = vpop.eup %646 }
 0x21f   : > { %v343_v60 = vmul.f32 0.6931472, %v647_v55 }
 0x221   : > { %v291_v52 = vpop.xlane.xlu2 %290  ;;  %v344_v0 = vadd.f32 %v343_v60, %v340_v62 }
 0x222   : > { %v292_v53 = vadd.f32 %v291_v52, %v284_v51  ;;  %v349_v54 = vld [vmem:[#allocation5] sm:$0xff] }
 0x223   : > { %vm355_vm7 = vcmp.ne.s32.totalorder %v349_v54, %v889_v16  ;;  %vm350_vm8 = vcmp.eq.s32.totalorder %v349_v54, %v889_v16 }
 0x224   : > { %294 = vst.msk [vmem:[#allocation4] sm:$0xff] %vm239_vm1, %v292_v53  ;;  %vm356_vm9 = vmand %vm345_vm3, %vm355_vm7  ;;  %v565_v56 = vsel %vm350_vm8, 1.0, %v764_v7 }
 0x225   : > { %v357_v57 = vsel %vm356_vm9, 1.0, %v764_v7  ;;  %v365_v58 = vsel %vm239_vm1, %v565_v56, 0.0 }
 0x226   : > { %409 = vperm.xlu2 %641, %v357_v57   ;;  %v366_v59 = vrot.slane %v365_v58, 4 }
 0x228   : > { %v367_v61 = vadd.f32 %v366_v59, %v365_v58 }
 0x22a   : > { %v368_v63 = vrot.slane %v367_v61, 2 }
 0x22b   : > { %v346_v1 = vld [vmem:[#allocation4] sm:$0xff] }
 0x22c   : > { %v369_v2 = vadd.f32 %v368_v63, %v367_v61  ;;  %v347_v3 = vsub.f32 %v344_v0, %v346_v1 }
 0x22e   : > { %v370_v4 = vrot.slane %v369_v2, 1  ;;  %v348_v5 = vsel %vm345_vm3, %v347_v3, 0.0 }
 0x22f   : > { %v358_v6 = vsel %vm239_vm1, %v348_v5, 0.0  ;;  %vm419_vm1 = vcmp.eq.s32.totalorder %v401_v18, 0 }
 0x230   : > { %v371_v9 = vadd.f32 %v370_v4, %v369_v2  ;;  %v359_v7 = vrot.slane %v358_v6, 4 }
 0x232   : > { %390 = vperm.xlu1 %640, %v371_v9   ;;  %v360_v11 = vadd.f32 %v359_v7, %v358_v6 }
 0x234   : > { %v361_v12 = vrot.slane %v360_v11, 2 }
 0x236   : > { %v362_v13 = vadd.f32 %v361_v12, %v360_v11 }
 0x238   : > { %v363_v14 = vrot.slane %v362_v13, 1 }
 0x23a   : > { %v364_v15 = vadd.f32 %v363_v14, %v362_v13 }
 0x23c   : > { %396 = vperm.xlu0 %639, %v364_v15  }
 0x280   : > { %v410_v16 = vpop.permute.xlu2 %409 }
 0x281   : > { %v412_v20 = vsel %vm406_vm12, %v410_v16, 0.0 }
 0x282   : > { %v413_v21 = vrot.slane %v412_v20, 4 }
 0x284   : > { %v414_v22 = vadd.f32 %v413_v21, %v412_v20 }
 0x286   : > { %v415_v23 = vrot.slane %v414_v22, 2 }
 0x288   : > { %v416_v25 = vadd.f32 %v415_v23, %v414_v22 }
 0x28a   : > { %v417_v26 = vrot.slane %v416_v25, 1 }
 0x28c   : > { %v418_v8 = vadd.f32 %v417_v26, %v416_v25 }
 0x28e   : > { %v421_v31 = vsel %vm420_vm0, %v418_v8, 0.0 }
 0x2a4   : > { %v391_v27 = vpop.permute.xlu1 %390 }
 0x2a5   : > { %v393_v29 = vsel %vm380_vm14, %v391_v27, %v387_v28 }
 0x2ae   : > { %v397_v30 = vpop.permute.xlu0 %396 }
 0x2af   : > { %v399_v32 = vsel %vm379_vm15, %v397_v30, %v393_v29 }
 0x2b0   : > { %v422_v33 = vsel %vm419_vm1, %v399_v32, %v421_v31 }
 0x2b1   : > { %423 = vst [vmem:[%s225_s19] sm:$0xff] %v422_v33 }
 0x2b2   : > { %705 = shalt.err (!%p702_p0)
}
 0x2b3   : > { %575 = dma.vmem_to_hbm [thread:$0]  (%p837_p9), %s438_s21, 128, %s440_s22, %s425_s15  }
 0x2b4 PF: > { %s451_s11 = sand.u32 1, %s740_s12   ;;  %p582_p1 = pnand %p549_p12, %p844_p11 }
 0x2b5   : > { %s452_s6 = scalar_lea.sflag [#allocation8], %s451_s11 }
 0x2b6   : > { %p583_p2 = pneg %p582_p1 }
 0x2b8   : > { %735 = dma.done.wait (%p583_p2), %s452_s6, 128  }
 0x2b9   : > { %737 = vsyncadd (%p583_p2), %s452_s6, 4294967168  ;;  %s19_s17 = sadd.s32 1, %s760_s17   ;;  %s964_s12 = smov %s744_s13 }
 0x2ba   : > { %p16_p3 = scmp.ge.s32.totalorder %s19_s17, 4   ;;  %s965_s13 = smov %s748_s14 }
 0x2bb   : > { %s966_s14 = smov %s842_s26  ;;  %s967_s15 = smov %s756_s16 }
 0x2bc   : > { %s968_s16 = smov %s970_s20  ;;  %18 = sbr.rel (!%p16_p3) target bundleno = 6 (0x6), region = 91 }
 0x2c1   :  { %458 = vsyncpa [#allocation7], 1 }
 0x2c2   :  { %460 = vsyncpa [#allocation7 + $0x1], 1 }
 0x2c3   :  { %461 = vsyncpa [#allocation8], 1 }
 0x2c4   :  { %463 = vsyncpa [#allocation8 + $0x1], 1 }

</bundles_post_ra>
